<compile_context>
chip_gen: v6e
topology: v6e:2x2x1
jax: 0.10.0
libtpu: 0.0.40
codegen_flags: <defaults>
</compile_context>

<pallas_src>
import functools

import jax
import jax.numpy as jnp
from jax.experimental import pallas as pl
from jax.experimental.pallas import tpu as pltpu

LANE = 128  # slab lane width (one vreg lane tile)


# ---------------------------------------------------------------------------
# Parameter packing (one-time prep; nothing here runs per forward call)
# ---------------------------------------------------------------------------
def _row_layout(input_size, hidden_size):
    """Row offsets of each tensor inside the packed (rows, 128) param slab."""
    r_w1 = 0
    r_b1 = r_w1 + input_size
    r_w2 = r_b1 + 1
    r_b2 = r_w2 + hidden_size
    r_w3 = r_b2 + 1
    r_b3 = r_w3 + hidden_size
    total = r_b3 + 1
    slab_rows = 8 * ((total + 7) // 8)          # pad rows to sublane multiple
    offs = dict(r_w1=r_w1, r_b1=r_b1, r_w2=r_w2, r_b2=r_b2, r_w3=r_w3, r_b3=r_b3)
    return offs, slab_rows


def pack_params(params, input_size, hidden_size, output_size):
    """Pack w1,b1,w2,b2,w3,b3 into one f32 (slab_rows, 128) array. Call once."""
    offs, slab_rows = _row_layout(input_size, hidden_size)
    f32 = lambda a: jnp.asarray(a, jnp.float32)
    slab = jnp.zeros((slab_rows, LANE), jnp.float32)
    slab = slab.at[offs["r_w1"]:offs["r_w1"] + input_size, :hidden_size].set(f32(params["w1"]))
    slab = slab.at[offs["r_b1"]:offs["r_b1"] + 1, :hidden_size].set(f32(params["b1"]).reshape(1, hidden_size))
    slab = slab.at[offs["r_w2"]:offs["r_w2"] + hidden_size, :hidden_size].set(f32(params["w2"]))
    slab = slab.at[offs["r_b2"]:offs["r_b2"] + 1, :hidden_size].set(f32(params["b2"]).reshape(1, hidden_size))
    slab = slab.at[offs["r_w3"]:offs["r_w3"] + hidden_size, :output_size].set(f32(params["w3"]))
    slab = slab.at[offs["r_b3"]:offs["r_b3"] + 1, :output_size].set(f32(params["b3"]).reshape(1, output_size))
    return jax.device_put(slab)


# ---------------------------------------------------------------------------
# Kernel: fused 3-layer MLP, weights carved out of one resident param slab
# ---------------------------------------------------------------------------
def _mlp_kernel(x_ref, p_ref, o_ref, *, input_size, hidden_size, output_size,
                r_w1, r_b1, r_w2, r_b2, r_w3, r_b3):
    # x_ref: (block_rows, input_size) f32
    # p_ref: (slab_rows, 128) f32 -- same block every grid step (VMEM-resident)
    # o_ref: (block_rows, output_size) f32
    x = x_ref[...]

    w1 = p_ref[r_w1:r_w1 + input_size, 0:hidden_size]
    b1 = p_ref[r_b1:r_b1 + 1, 0:hidden_size]
    w2 = p_ref[r_w2:r_w2 + hidden_size, 0:hidden_size]
    b2 = p_ref[r_b2:r_b2 + 1, 0:hidden_size]
    w3 = p_ref[r_w3:r_w3 + hidden_size, 0:output_size]
    b3 = p_ref[r_b3:r_b3 + 1, 0:output_size]

    h1 = jnp.tanh(jnp.dot(x, w1, preferred_element_type=jnp.float32) + b1)
    h2 = jnp.tanh(jnp.dot(h1, w2, preferred_element_type=jnp.float32) + b2)
    o_ref[...] = jnp.dot(h2, w3, preferred_element_type=jnp.float32) + b3


# ---------------------------------------------------------------------------
# Builder: returns a jitted forward(x, slab) -> (batch, output_size)
# ---------------------------------------------------------------------------
def build_full_controller(input_size, hidden_size, output_size, *,
                          batch=1, block_rows=None):
    if block_rows is None:
        block_rows = batch if batch < 8 else 8
    assert batch % block_rows == 0, "batch must be a multiple of block_rows"
    offs, slab_rows = _row_layout(input_size, hidden_size)

    kernel = functools.partial(
        _mlp_kernel, input_size=input_size, hidden_size=hidden_size,
        output_size=output_size, **offs)

    call = pl.pallas_call(
        kernel,
        out_shape=jax.ShapeDtypeStruct((batch, output_size), jnp.float32),
        grid=(batch // block_rows,),
        in_specs=[
            # Per-step row block of the input.
            pl.BlockSpec((block_rows, input_size), lambda i: (i, 0)),
            # Constant block index => weights DMA'd once, resident across steps.
            pl.BlockSpec((slab_rows, LANE), lambda i: (0, 0)),
        ],
        out_specs=pl.BlockSpec((block_rows, output_size), lambda i: (i, 0)),
        compiler_params=pltpu.CompilerParams(
            dimension_semantics=("parallel",)),   # 2 TCs on v7x; no-op v5e/v6e
    )

    @jax.jit
    def forward(x, slab):
        x2d = x.reshape(batch, input_size).astype(jnp.float32)
        return call(x2d, slab)

    return forward


# ---------------------------------------------------------------------------
# Init (PyTorch nn.Linear default init, weights stored as (in, out)) + ref
# ---------------------------------------------------------------------------
def init_params(key, input_size, hidden_size, output_size):
    ks = jax.random.split(key, 6)
    k1 = 1.0 / jnp.sqrt(input_size)
    k2 = 1.0 / jnp.sqrt(hidden_size)
    k3 = 1.0 / jnp.sqrt(hidden_size)
    return dict(
        w1=jax.random.uniform(ks[0], (input_size, hidden_size), jnp.float32, -k1, k1),
        b1=jax.random.uniform(ks[1], (1, hidden_size), jnp.float32, -k1, k1),
        w2=jax.random.uniform(ks[2], (hidden_size, hidden_size), jnp.float32, -k2, k2),
        b2=jax.random.uniform(ks[3], (1, hidden_size), jnp.float32, -k2, k2),
        w3=jax.random.uniform(ks[4], (hidden_size, output_size), jnp.float32, -k3, k3),
        b3=jax.random.uniform(ks[5], (1, output_size), jnp.float32, -k3, k3),
    )


def full_controller_ref(x, params, input_size):
    """Pure-JAX reference (PyTorch Linear/tanh semantics)."""
    x2d = x.reshape(-1, input_size).astype(jnp.float32)
    h1 = jnp.tanh(x2d @ params["w1"] + params["b1"])
    h2 = jnp.tanh(h1 @ params["w2"] + params["b2"])
    return h2 @ params["w3"] + params["b3"]


if __name__ == "__main__":
    input_size, hidden_size, output_size = 16, 32, 8

    key = jax.random.PRNGKey(0)
    k_param, k_x, k_xb = jax.random.split(key, 3)
    params = init_params(k_param, input_size, hidden_size, output_size)
    slab = pack_params(params, input_size, hidden_size, output_size)  # one-time

    # --- spec-shaped single-step forward: (input_size,) -> (1, 1, output_size)
    fwd_single = build_full_controller(input_size, hidden_size, output_size,
                                       batch=1, block_rows=1)
    x = jax.random.normal(k_x, (input_size,), jnp.float32)
    out = fwd_single(x, slab).reshape(1, 1, output_size)
    out = jax.block_until_ready(out)

    ref = full_controller_ref(x, params, input_size).reshape(1, 1, output_size)
    assert out.shape == (1, 1, output_size)
    assert jnp.allclose(out, ref, atol=1e-5, rtol=1e-5)

    # --- batched / rollout-folded path: weights resident in VMEM across grid
    T = 64
    fwd_batched = build_full_controller(input_size, hidden_size, output_size,
                                        batch=T, block_rows=8)
    xb = jax.random.normal(k_xb, (T, input_size), jnp.float32)
    outb = jax.block_until_ready(fwd_batched(xb, slab))

    refb = full_controller_ref(xb, params, input_size)
    assert outb.shape == (T, output_size)
    assert jnp.allclose(outb, refb, atol=1e-5, rtol=1e-5)

    print("KERNEL_OK")
</pallas_src>

<mosaic_0001>
module attributes {stable_mosaic.version = 11 : i64} {
  func.func @_mlp_kernel(%arg0: i32, %arg1: memref<1x16xf32, #tpu.memory_space<vmem>>, %arg2: memref<88x128xf32, #tpu.memory_space<vmem>>, %arg3: memref<1x8xf32, #tpu.memory_space<vmem>>) attributes {dimension_semantics = [#tpu.dimension_semantics<parallel>], iteration_bounds = array<i64: 1>, scalar_prefetch = 0 : i64, scratch_operands = 0 : i64, tpu.core_type = #tpu.core_type<tc>, window_params = [{transform_indices = @transform_0, window_bounds = array<i64: 1, 16>}, {pipeline_mode = #tpu.pipeline_mode<synchronous>, transform_indices = @transform_1, window_bounds = array<i64: 88, 128>}, {transform_indices = @transform_2, window_bounds = array<i64: 1, 8>}]} {
    %c0 = arith.constant 0 : index
    %c0_0 = arith.constant 0 : index
    %0 = vector.load %arg1[%c0, %c0_0] : memref<1x16xf32, #tpu.memory_space<vmem>>, vector<1x16xf32>
    %c0_1 = arith.constant 0 : index
    %c0_2 = arith.constant 0 : index
    %1 = vector.load %arg2[%c0_1, %c0_2] : memref<88x128xf32, #tpu.memory_space<vmem>>, vector<16x32xf32>
    %c16 = arith.constant 16 : index
    %c0_3 = arith.constant 0 : index
    %2 = vector.load %arg2[%c16, %c0_3] : memref<88x128xf32, #tpu.memory_space<vmem>>, vector<1x32xf32>
    %c17 = arith.constant 17 : index
    %c0_4 = arith.constant 0 : index
    %3 = vector.load %arg2[%c17, %c0_4] : memref<88x128xf32, #tpu.memory_space<vmem>>, vector<32x32xf32>
    %c49 = arith.constant 49 : index
    %c0_5 = arith.constant 0 : index
    %4 = vector.load %arg2[%c49, %c0_5] : memref<88x128xf32, #tpu.memory_space<vmem>>, vector<1x32xf32>
    %c50 = arith.constant 50 : index
    %c0_6 = arith.constant 0 : index
    %5 = vector.load %arg2[%c50, %c0_6] : memref<88x128xf32, #tpu.memory_space<vmem>>, vector<32x8xf32>
    %c82 = arith.constant 82 : index
    %c0_7 = arith.constant 0 : index
    %6 = vector.load %arg2[%c82, %c0_7] : memref<88x128xf32, #tpu.memory_space<vmem>>, vector<1x8xf32>
    %cst = arith.constant dense<0.000000e+00> : vector<1x32xf32>
    %7 = tpu.matmul %0, %1, %cst {dimension_numbers = #tpu.dot_dimension_numbers<[1], [0], [0], [1], [0, 0, 1, 1], [], []>} : vector<1x16xf32>, vector<16x32xf32>, vector<1x32xf32> -> vector<1x32xf32>
    %8 = arith.addf %7, %2 : vector<1x32xf32>
    %9 = math.tanh %8 : vector<1x32xf32>
    %cst_8 = arith.constant dense<0.000000e+00> : vector<1x32xf32>
    %10 = tpu.matmul %9, %3, %cst_8 {dimension_numbers = #tpu.dot_dimension_numbers<[1], [0], [0], [1], [0, 0, 1, 1], [], []>} : vector<1x32xf32>, vector<32x32xf32>, vector<1x32xf32> -> vector<1x32xf32>
    %11 = arith.addf %10, %4 : vector<1x32xf32>
    %12 = math.tanh %11 : vector<1x32xf32>
    %cst_9 = arith.constant dense<0.000000e+00> : vector<1x8xf32>
    %13 = tpu.matmul %12, %5, %cst_9 {dimension_numbers = #tpu.dot_dimension_numbers<[1], [0], [0], [1], [0, 0, 1, 1], [], []>} : vector<1x32xf32>, vector<32x8xf32>, vector<1x8xf32> -> vector<1x8xf32>
    %14 = arith.addf %13, %6 : vector<1x8xf32>
    %c0_10 = arith.constant 0 : index
    %c0_11 = arith.constant 0 : index
    %15 = vector.load %arg3[%c0_10, %c0_11] : memref<1x8xf32, #tpu.memory_space<vmem>>, vector<1x8xf32>
    tpu.vector_store %arg3[%c0_10, %c0_11], %14 {strides = array<i32>} : memref<1x8xf32, #tpu.memory_space<vmem>>, vector<1x8xf32>,
    return
  }
  func.func @transform_0(%arg0: i32) -> (i32, i32) {
    %c0_i32 = arith.constant 0 : i32
    %c0_i32_0 = arith.constant 0 : i32
    return %arg0, %c0_i32 : i32, i32
  }
  func.func @transform_1(%arg0: i32) -> (i32, i32) {
    %c0_i32 = arith.constant 0 : i32
    %c0_i32_0 = arith.constant 0 : i32
    %c0_i32_1 = arith.constant 0 : i32
    return %c0_i32, %c0_i32_0 : i32, i32
  }
  func.func @transform_2(%arg0: i32) -> (i32, i32) {
    %c0_i32 = arith.constant 0 : i32
    %c0_i32_0 = arith.constant 0 : i32
    return %arg0, %c0_i32 : i32, i32
  }
}

</mosaic_0001>

<bundles_post_ra>
// kernel: forward.1
= control target key start
LH: loop header
LB: loop body
LE: loop exit
PB: predicated region body
PF: predicated region fallthrough
CT: control target
= control target key end

     0   :  { %7 = vsyncpa [#allocation3], 0  ;;  %s411_s0 = inlined_call_operand.vmem [shape: f32[1,16], index: 0, kind: input, shape index: {}]   ;;  %s412_s1 = inlined_call_operand.hbm [shape: f32[88,128], index: 1, kind: input, shape index: {}]   ;;  %s413_s2 = inlined_call_operand.hbm [shape: f32[1,8], index: 2, kind: output, shape index: {}]  }
   0x1   :  { %8 = vsyncpa [#allocation4], 0  ;;  %s379_s9 = smov [#allocation2]  }
   0x2   :  { %s16_s10 = sshll.u32 %s379_s9, 4  ;;  %s17_s10 = int_to_ptr.vmem [resolvable:$true] %s16_s10 }
   0x3   :  { %s343_s11 = scalar_lea.vmem %s17_s10, 1408  ;;  %p348_p1 = scmp.lt.s32.totalorder %s17_s10, %s17_s10 }
   0x4   :  { %p344_p0 = scmp.ne.s32.totalorder %s17_s10, %s343_s11  ;;  %p349_p2 = scmp.lt.s32.totalorder %s343_s11, %s343_s11 }
   0x6   :  { %p350_p3 = por %p349_p2, %p348_p1 }
   0x8   :  { %p351_p4 = pnand %p350_p3, %p344_p0 }
   0xa   :  { %354 = shalt.err (!%p351_p4)
}
   0xb   :  { %s380_s12 = smov 128   ;;  %s381_s13 = smov 8  }
   0xc   :  { %22 = dma.hbm_to_vmem [thread:$0]  %s412_s1, 1408, %s17_s10, [#allocation3], %s380_s12, %s380_s12, %s381_s13  }
   0xd   :  { %375 = dma.done.wait [#allocation3], 1408  }
   0xe   :  { %376 = vsyncadd [#allocation3], 4294965888  ;;  %v382_v0 = vmov 0.0   ;;  %vm383_vm0 = vmmov 0   ;;  %v28_v1 = vld [vmem:[#allocation2 + $0x8] sm:$0xff]  ;;  %v27_v2 = vld [vmem:[#allocation2] sm:$0xff] }
   0xf   :  { %296 = vmatprep.subr.mxu0 %v382_v0  ;;  %300 = vmatprep.mubr.msk.f32.mxu0 %vm383_vm0, %v382_v0  ;;  %v26_v3 = vld [vmem:[%s411_s0] sm:$0x1]  ;;  %vm40_vm1 = vcmask 130048   ;;  %v33_v4 = vld [vmem:[#allocation2 + $0x29] sm:$0xff]  ;;  %v32_v5 = vld [vmem:[#allocation2 + $0x21] sm:$0xff]  ;;  %vm115_vm2 = vcmask 261120  }
  0x10   :  { %303 = vmatprep.subr.mxu1 %v382_v0  ;;  %311 = vmatprep.mubr.msk.f32.mxu1 %vm383_vm0, %v382_v0  ;;  %v31_v6 = vld [vmem:[#allocation2 + $0x19] sm:$0xff]  ;;  %v30_v7 = vld [vmem:[#allocation2 + $0x11] sm:$0xff]  ;;  %v29_v8 = vld [vmem:[#allocation2 + $0x10] sm:$0x1]  ;;  %s384_s0 = smov [#allocation5]   ;;  %vm263_vm3 = vcmask 57344  }
  0x11   :  { %297 = vmatpush3.msra.mxu0 %v28_v1  ;;  %304 = vmatpush3.msra.mxu1 %v33_v4  ;;  %v38_v13 = vld [vmem:[#allocation2 + $0x4a] sm:$0xff]  ;;  %v37_v14 = vld [vmem:[#allocation2 + $0x42] sm:$0xff]  ;;  %v36_v15 = vld [vmem:[#allocation2 + $0x3a] sm:$0xff]  ;;  %s271_s1 = sshll.u32 %s384_s0, 4  ;;  %s272_s1 = int_to_ptr.vmem [resolvable:$true] %s271_s1 }
  0x12   :  { %298 = vmatprep.subr.mxu0 %v382_v0  ;;  %305 = vmatprep.subr.mxu1 %v382_v0  ;;  %v35_v16 = vld [vmem:[#allocation2 + $0x32] sm:$0xff]  ;;  %v34_v17 = vld [vmem:[#allocation2 + $0x31] sm:$0x1]  ;;  %s355_s18 = scalar_lea.vmem %s272_s1, 16  ;;  %s359_s19 = scalar_lea.vmem %s272_s1, 32 }
  0x13   :  { %299 = vmatpush3.msra.mxu0 %v27_v2  ;;  %306 = vmatpush3.msra.mxu1 %v32_v5  ;;  %v39_v22 = vld [vmem:[#allocation2 + $0x52] sm:$0x1]  ;;  %p356_p5 = scmp.ne.s32.totalorder %s272_s1, %s355_s18  ;;  %p360_p6 = scmp.lt.s32.totalorder %s272_s1, %s272_s1 }
  0x14   :  { %301 = vmatmul.mubr.msk.f32.vlgmr.msra.gmra.mxu0 %vm40_vm1, %v26_v3  ;;  %314 = vmatprep.subr.mxu0 %v382_v0  ;;  %p361_p7 = scmp.lt.s32.totalorder %s359_s19, %s355_s18 }
  0x15   :  { %322 = vmatprep.mubr.msk.f32.mxu0 %vm383_vm0, %v382_v0  ;;  %307 = vmatprep.subr.mxu1 %v382_v0 }
  0x16   :  { %308 = vmatpush3.msra.mxu1 %v31_v6  ;;  %315 = vmatpush3.msra.mxu0 %v38_v13  ;;  %p362_p8 = por %p361_p7, %p360_p6 }
  0x17   :  { %309 = vmatprep.subr.mxu1 %v382_v0  ;;  %316 = vmatprep.subr.mxu0 %v382_v0 }
  0x18   :  { %310 = vmatpush3.msra.mxu1 %v30_v7  ;;  %317 = vmatpush3.msra.mxu0 %v37_v14  ;;  %p363_p9 = pnand %p362_p8, %p356_p5 }
  0x19   :  { %318 = vmatprep.subr.mxu0 %v382_v0 }
  0x1a   :  { %319 = vmatpush3.msra.mxu0 %v36_v15 }
  0x1b   :  { %320 = vmatprep.subr.mxu0 %v382_v0 }
  0x1c   :  { %321 = vmatpush3.msra.mxu0 %v35_v16 }
  0xd4   :  { %v110_v9 = vpop.f32.mrf.mxu0 }
  0xd5   :  { %v111_v10 = vadd.f32 %v110_v9, %v29_v8 }
  0xd6   :  { %v302_v11 = vpop.f32.mrf.mxu0 }
  0xd7   :  { %331 = vtanh.f32 %v111_v10 }
  0xe4   :  { %v332_v12 = vpop.eup %331 }
  0xe5   :  { %312 = vmatmul.mubr.msk.f32.vlgmr.msra.gmra.mxu1 %vm115_vm2, %v332_v12 }
 0x1a5   :  { %v185_v18 = vpop.f32.mrf.mxu1 }
 0x1a6   :  { %v186_v19 = vadd.f32 %v185_v18, %v34_v17 }
 0x1a7   :  { %v313_v20 = vpop.f32.mrf.mxu1 }
 0x1a8   :  { %333 = vtanh.f32 %v186_v19 }
 0x1b5   :  { %v334_v21 = vpop.eup %333 }
 0x1b6   :  { %323 = vmatmul.mubr.msk.f32.vlgmr.msra.gmra.mxu0 %vm115_vm2, %v334_v21 }
 0x276   :  { %v259_v23 = vpop.f32.mrf.mxu0 }
 0x277   :  { %v260_v24 = vadd.f32 %v259_v23, %v39_v22 }
 0x278   :  { %v324_v25 = vpop.f32.mrf.mxu0 }
 0x279   :  { %264 = vst.msk [vmem:[#allocation5] sm:$0x1] %vm263_vm3, %v260_v24 }
 0x27a   :  { %366 = shalt.err (!%p363_p9)
}
 0x27b   :  { %274 = dma.vmem_to_hbm [thread:$0]  %s272_s1, 16, %s413_s2, [#allocation4]  }
 0x27c   :  { %377 = dma.done.wait [#allocation4], 16  }
 0x27d   :  { %378 = vsyncadd [#allocation4], 4294967280 }
 0x27e   :  { %278 = vsyncpa [#allocation3], 1 }
 0x27f   :  { %279 = vsyncpa [#allocation4], 1 }

</bundles_post_ra>
